<compile_context>
chip_gen: v7x
topology: tpu7x:2x2x1
jax: 0.10.0
libtpu: 0.0.40
codegen_flags: <defaults>
</compile_context>

<pallas_src>
import jax
import jax.numpy as jnp
from jax.experimental import pallas as pl
from jax.experimental.pallas import tpu as pltpu

# Model hyper-parameters (from the PyTorch script)
DW = 300          # embedding / LSTM input size
DH = 50           # LSTM hidden size
VOCAB = 100       # synthetic vocab size
OUT = 4           # output classes
B = 2             # batch
T = 8             # (padded) sequence length

# Each LSTM gate block padded to the 128-lane vreg width -> lane-aligned slices.
DHP = 128


def _lstm_recurrence_kernel(pre_ref, whh_ref, len_ref, h_out_ref):
    """Single invocation: the whole time loop runs inside the kernel.

    pre_ref : (T, B, 4*DHP) f32   precomputed x_t @ W_ih^T + b (g-block pre-scaled x2,
                                  gates zero-padded to 128 lanes)
    whh_ref : (DHP, 4*DHP) bf16   recurrent weights (g-block x2), zero-padded rows/cols
    len_ref : (B, DHP) int32      sequence lengths broadcast across lanes
    h_out   : (B, DHP) f32        final hidden state (lane-dense output)
    """
    seq = pre_ref.shape[0]
    bsz = pre_ref.shape[1]

    w_hh = whh_ref[...]            # bf16, resident across the whole loop
    len_vec = len_ref[...]         # (B, DHP) int32, resident

    def step(t, carry):
        h_prev, c_prev = carry

        # Only MXU op on the serial critical path: bf16 (B, DHP) x (DHP, 4*DHP),
        # f32 accumulation.
        rec = jnp.dot(h_prev.astype(jnp.bfloat16), w_hh,
                      preferred_element_type=jnp.float32)
        gates = pre_ref[t] + rec                      # (B, 4*DHP) f32

        # One sigmoid over the whole slab; g recovered via tanh(x)=2*sigmoid(2x)-1
        # (its pre-activation was pre-scaled by 2 in the wrapper).
        s = jax.nn.sigmoid(gates)
        i_g = s[:, 0 * DHP:1 * DHP]
        f_g = s[:, 1 * DHP:2 * DHP]
        g_g = 2.0 * s[:, 2 * DHP:3 * DHP] - 1.0
        o_g = s[:, 3 * DHP:4 * DHP]

        c_new = f_g * c_prev + i_g * g_g
        h_new = o_g * jnp.tanh(c_new)

        # packed-sequence semantics: freeze state once t >= length[b]
        keep = t < len_vec                            # (B, DHP) bool, cheap compare
        h = jnp.where(keep, h_new, h_prev)            # single vsel per vreg
        c = jnp.where(keep, c_new, c_prev)
        return (h, c)

    h0 = jnp.zeros((bsz, DHP), jnp.float32)
    c0 = jnp.zeros((bsz, DHP), jnp.float32)
    h_fin, _ = jax.lax.fori_loop(0, seq, step, (h0, c0),
                                 unroll=min(int(seq), 8))
    h_out_ref[...] = h_fin


def _pad_gate_cols(w, dh, dhp, g_scale=1.0):
    """(..., 4*dh) -> (..., 4*dhp): zero-pad each gate block to dhp columns.

    The g-gate block (index 2; PyTorch order i, f, g, o) is scaled by `g_scale`
    so the kernel can use tanh(x) = 2*sigmoid(2x) - 1.  Padded columns stay 0.
    """
    lead = w.shape[:-1]
    w4 = w.reshape(*lead, 4, dh)
    scale = jnp.ones((4, 1), w.dtype).at[2, 0].set(g_scale)
    w4 = w4 * scale
    pad = [(0, 0)] * (w4.ndim - 1) + [(0, dhp - dh)]
    return jnp.pad(w4, pad).reshape(*lead, 4 * dhp)


@jax.jit
def rnn_forward(token_ids, lengs, emb_table, w_ih_t, w_hh_t, b_gates,
                w_out_t, b_out):
    """token_ids: (B, T) int32, lengs: (B,) int32. Returns (B, OUT) f32 probs."""
    bsz, seq = token_ids.shape
    dh = w_hh_t.shape[0]
    dhp = DHP

    # ---- XLA-side glue: embedding gather + time-major layout ----
    x_emb = jnp.take(emb_table, token_ids, axis=0)            # (B, T, DW)
    x_tm = jnp.transpose(x_emb, (1, 0, 2))                    # (T, B, DW)

    # ---- lane-padded (and g-block x2 pre-scaled) parameter layout ----
    w_ih_pad = _pad_gate_cols(w_ih_t, dh, dhp, 2.0)           # (DW, 4*DHP)
    b_pad = _pad_gate_cols(b_gates, dh, dhp, 2.0)             # (1, 4*DHP)
    w_hh_pad = _pad_gate_cols(w_hh_t, dh, dhp, 2.0)           # (DH, 4*DHP)
    w_hh_pad = jnp.pad(w_hh_pad, ((0, dhp - dh), (0, 0)))     # (DHP, 4*DHP)
    w_hh_bf16 = w_hh_pad.astype(jnp.bfloat16)                 # bf16 MXU operand

    # ---- hoisted input projection: one batched matmul for all timesteps ----
    pre_flat = x_tm.reshape(seq * bsz, -1) @ w_ih_pad         # (T*B, 4*DHP)
    pre_gates = pre_flat.reshape(seq, bsz, 4 * dhp) + b_pad   # (T, B, 4*DHP)

    # ---- packed-sequence lengths, lane-dense (tiny; replaces (T,B,DHP) mask) ----
    len_vec = jnp.broadcast_to(lengs.astype(jnp.int32)[:, None], (bsz, dhp))

    # ---- single-shot Pallas kernel: pure LSTM recurrence ----
    h_fin = pl.pallas_call(
        _lstm_recurrence_kernel,
        out_shape=jax.ShapeDtypeStruct((bsz, dhp), jnp.float32),
        in_specs=[
            pl.BlockSpec(memory_space=pltpu.MemorySpace.VMEM),   # pre_gates
            pl.BlockSpec(memory_space=pltpu.MemorySpace.VMEM),   # W_hh (bf16, padded)
            pl.BlockSpec(memory_space=pltpu.MemorySpace.VMEM),   # lengths
        ],
        out_specs=pl.BlockSpec(memory_space=pltpu.MemorySpace.VMEM),
    )(pre_gates, w_hh_bf16, len_vec)

    # ---- classifier epilogue in XLA (runs once, lane-sparse (B, 4) output) ----
    logits = h_fin[:, :dh] @ w_out_t + b_out
    return jax.nn.softmax(logits, axis=1)


def _reference_forward(token_ids, lengs, emb_table, w_ih_t, w_hh_t, b_gates,
                       w_out_t, b_out):
    """Pure-JAX f32 reference with identical semantics (for sanity checking)."""
    x = jnp.take(emb_table, token_ids, axis=0)                 # (B, T, DW)
    bsz = token_ids.shape[0]
    h = jnp.zeros((bsz, DH), jnp.float32)
    c = jnp.zeros((bsz, DH), jnp.float32)

    def step(carry, inp):
        h, c = carry
        x_t, t = inp
        gates = x_t @ w_ih_t + h @ w_hh_t + b_gates
        i = jax.nn.sigmoid(gates[:, 0 * DH:1 * DH])
        f = jax.nn.sigmoid(gates[:, 1 * DH:2 * DH])
        g = jnp.tanh(gates[:, 2 * DH:3 * DH])
        o = jax.nn.sigmoid(gates[:, 3 * DH:4 * DH])
        c_new = f * c + i * g
        h_new = o * jnp.tanh(c_new)
        mask = (t < lengs)[:, None]
        return (jnp.where(mask, h_new, h), jnp.where(mask, c_new, c)), None

    (h, c), _ = jax.lax.scan(step, (h, c),
                             (jnp.transpose(x, (1, 0, 2)), jnp.arange(T)))
    logits = h @ w_out_t + b_out
    return jax.nn.softmax(logits, axis=1)


if __name__ == "__main__":
    key = jax.random.PRNGKey(0)
    k_emb, k_ih, k_hh, k_b1, k_b2, k_out, k_bo, k_tok = jax.random.split(key, 8)

    # Deterministic synthetic parameters (PyTorch-like small uniform init).
    scale = 1.0 / jnp.sqrt(DH)
    emb_table = jax.random.normal(k_emb, (VOCAB, DW), jnp.float32) * 0.1
    emb_table = emb_table.at[0].set(0.0)                       # padding_idx=0
    w_ih_t = jax.random.uniform(k_ih, (DW, 4 * DH), jnp.float32, -scale, scale)
    w_hh_t = jax.random.uniform(k_hh, (DH, 4 * DH), jnp.float32, -scale, scale)
    b_gates = (jax.random.uniform(k_b1, (1, 4 * DH), jnp.float32, -scale, scale)
               + jax.random.uniform(k_b2, (1, 4 * DH), jnp.float32, -scale, scale))
    w_out_t = jax.random.uniform(k_out, (DH, OUT), jnp.float32, -scale, scale)
    b_out = jax.random.uniform(k_bo, (1, OUT), jnp.float32, -scale, scale)

    # Inputs: padded token id batch + true lengths.
    lengs = jnp.array([8, 5], jnp.int32)                       # (B,)
    tok = jax.random.randint(k_tok, (B, T), 1, VOCAB, jnp.int32)
    pad_mask = jnp.arange(T)[None, :] < lengs[:, None]
    token_ids = jnp.where(pad_mask, tok, 0)                    # pad with idx 0

    probs = rnn_forward(token_ids, lengs, emb_table, w_ih_t, w_hh_t, b_gates,
                        w_out_t, b_out)
    probs = jax.block_until_ready(probs)

    ref = _reference_forward(token_ids, lengs, emb_table, w_ih_t, w_hh_t,
                             b_gates, w_out_t, b_out)
    assert probs.shape == (B, OUT)
    # Tolerance admits the deliberate bf16 recurrent-matmul operands
    # (accumulation in f32); any semantic bug (gate order, freeze mask,
    # padded-lane leakage) would be orders of magnitude larger.
    assert jnp.allclose(probs, ref, rtol=2e-3, atol=5e-4)
    assert jnp.allclose(jnp.sum(probs, axis=1), 1.0, rtol=1e-5, atol=1e-5)

    print("KERNEL_OK")
</pallas_src>

<mosaic_0001>
module attributes {stable_mosaic.version = 11 : i64} {
  func.func @_lstm_recurrence_kernel(%arg0: memref<8x2x512xf32, #tpu.memory_space<vmem>>, %arg1: memref<128x512xbf16, #tpu.memory_space<vmem>>, %arg2: memref<2x128xi32, #tpu.memory_space<vmem>>, %arg3: memref<2x128xf32, #tpu.memory_space<vmem>>) attributes {dimension_semantics = [], scalar_prefetch = 0 : i64, scratch_operands = 0 : i64, tpu.core_type = #tpu.core_type<tc>} {
    %c0 = arith.constant 0 : index
    %c0_0 = arith.constant 0 : index
    %0 = vector.load %arg1[%c0, %c0_0] : memref<128x512xbf16, #tpu.memory_space<vmem>>, vector<128x512xbf16>
    %c0_1 = arith.constant 0 : index
    %c0_2 = arith.constant 0 : index
    %1 = vector.load %arg2[%c0_1, %c0_2] : memref<2x128xi32, #tpu.memory_space<vmem>>, vector<2x128xi32>
    %cst = arith.constant 0.000000e+00 : f32
    %2 = vector.broadcast %cst : f32 to vector<2x128xf32>
    %cst_3 = arith.constant 0.000000e+00 : f32
    %3 = vector.broadcast %cst_3 : f32 to vector<2x128xf32>
    %c0_i32 = arith.constant 0 : i32
    %4 = arith.truncf %2 : vector<2x128xf32> to vector<2x128xbf16>
    %cst_4 = arith.constant dense<0.000000e+00> : vector<2x512xf32>
    %5 = tpu.matmul %4, %0, %cst_4 {dimension_numbers = #tpu.dot_dimension_numbers<[1], [0], [0], [1], [0, 0, 1, 1], [], []>} : vector<2x128xbf16>, vector<128x512xbf16>, vector<2x512xf32> -> vector<2x512xf32>
    %6 = arith.index_cast %c0_i32 : i32 to index
    %c0_5 = arith.constant 0 : index
    %c0_6 = arith.constant 0 : index
    %7 = vector.load %arg0[%6, %c0_5, %c0_6] : memref<8x2x512xf32, #tpu.memory_space<vmem>>, vector<1x2x512xf32>
    %8 = vector.shape_cast %7 : vector<1x2x512xf32> to vector<2x512xf32>
    %9 = arith.addf %8, %5 : vector<2x512xf32>
    %10 = arith.negf %9 : vector<2x512xf32>
    %11 = math.exp %10 : vector<2x512xf32>
    %cst_7 = arith.constant 1.000000e+00 : f32
    %12 = vector.broadcast %cst_7 : f32 to vector<2x512xf32>
    %13 = arith.addf %12, %11 : vector<2x512xf32>
    %14 = arith.divf %12, %13 : vector<2x512xf32>
    %15 = vector.extract_strided_slice %14 {offsets = [0, 0], sizes = [2, 128], strides = [1, 1]} : vector<2x512xf32> to vector<2x128xf32>
    %16 = vector.extract_strided_slice %14 {offsets = [0, 128], sizes = [2, 128], strides = [1, 1]} : vector<2x512xf32> to vector<2x128xf32>
    %17 = vector.extract_strided_slice %14 {offsets = [0, 256], sizes = [2, 128], strides = [1, 1]} : vector<2x512xf32> to vector<2x128xf32>
    %cst_8 = arith.constant 2.000000e+00 : f32
    %18 = vector.broadcast %cst_8 : f32 to vector<2x128xf32>
    %19 = arith.mulf %18, %17 : vector<2x128xf32>
    %cst_9 = arith.constant 1.000000e+00 : f32
    %20 = vector.broadcast %cst_9 : f32 to vector<2x128xf32>
    %21 = arith.subf %19, %20 : vector<2x128xf32>
    %22 = vector.extract_strided_slice %14 {offsets = [0, 384], sizes = [2, 128], strides = [1, 1]} : vector<2x512xf32> to vector<2x128xf32>
    %23 = arith.mulf %16, %3 : vector<2x128xf32>
    %24 = arith.mulf %15, %21 : vector<2x128xf32>
    %25 = arith.addf %23, %24 : vector<2x128xf32>
    %26 = math.tanh %25 : vector<2x128xf32>
    %27 = arith.mulf %22, %26 : vector<2x128xf32>
    %28 = vector.broadcast %c0_i32 : i32 to vector<2x128xi32>
    %29 = arith.cmpi slt, %28, %1 : vector<2x128xi32>
    %30 = arith.select %29, %27, %2 : vector<2x128xi1>, vector<2x128xf32>
    %31 = arith.select %29, %25, %3 : vector<2x128xi1>, vector<2x128xf32>
    %c1_i32 = arith.constant 1 : i32
    %32 = arith.truncf %30 : vector<2x128xf32> to vector<2x128xbf16>
    %cst_10 = arith.constant dense<0.000000e+00> : vector<2x512xf32>
    %33 = tpu.matmul %32, %0, %cst_10 {dimension_numbers = #tpu.dot_dimension_numbers<[1], [0], [0], [1], [0, 0, 1, 1], [], []>} : vector<2x128xbf16>, vector<128x512xbf16>, vector<2x512xf32> -> vector<2x512xf32>
    %34 = arith.index_cast %c1_i32 : i32 to index
    %c0_11 = arith.constant 0 : index
    %c0_12 = arith.constant 0 : index
    %35 = vector.load %arg0[%34, %c0_11, %c0_12] : memref<8x2x512xf32, #tpu.memory_space<vmem>>, vector<1x2x512xf32>
    %36 = vector.shape_cast %35 : vector<1x2x512xf32> to vector<2x512xf32>
    %37 = arith.addf %36, %33 : vector<2x512xf32>
    %38 = arith.negf %37 : vector<2x512xf32>
    %39 = math.exp %38 : vector<2x512xf32>
    %cst_13 = arith.constant 1.000000e+00 : f32
    %40 = vector.broadcast %cst_13 : f32 to vector<2x512xf32>
    %41 = arith.addf %40, %39 : vector<2x512xf32>
    %42 = arith.divf %40, %41 : vector<2x512xf32>
    %43 = vector.extract_strided_slice %42 {offsets = [0, 0], sizes = [2, 128], strides = [1, 1]} : vector<2x512xf32> to vector<2x128xf32>
    %44 = vector.extract_strided_slice %42 {offsets = [0, 128], sizes = [2, 128], strides = [1, 1]} : vector<2x512xf32> to vector<2x128xf32>
    %45 = vector.extract_strided_slice %42 {offsets = [0, 256], sizes = [2, 128], strides = [1, 1]} : vector<2x512xf32> to vector<2x128xf32>
    %cst_14 = arith.constant 2.000000e+00 : f32
    %46 = vector.broadcast %cst_14 : f32 to vector<2x128xf32>
    %47 = arith.mulf %46, %45 : vector<2x128xf32>
    %cst_15 = arith.constant 1.000000e+00 : f32
    %48 = vector.broadcast %cst_15 : f32 to vector<2x128xf32>
    %49 = arith.subf %47, %48 : vector<2x128xf32>
    %50 = vector.extract_strided_slice %42 {offsets = [0, 384], sizes = [2, 128], strides = [1, 1]} : vector<2x512xf32> to vector<2x128xf32>
    %51 = arith.mulf %44, %31 : vector<2x128xf32>
    %52 = arith.mulf %43, %49 : vector<2x128xf32>
    %53 = arith.addf %51, %52 : vector<2x128xf32>
    %54 = math.tanh %53 : vector<2x128xf32>
    %55 = arith.mulf %50, %54 : vector<2x128xf32>
    %56 = vector.broadcast %c1_i32 : i32 to vector<2x128xi32>
    %57 = arith.cmpi slt, %56, %1 : vector<2x128xi32>
    %58 = arith.select %57, %55, %30 : vector<2x128xi1>, vector<2x128xf32>
    %59 = arith.select %57, %53, %31 : vector<2x128xi1>, vector<2x128xf32>
    %c2_i32 = arith.constant 2 : i32
    %60 = arith.truncf %58 : vector<2x128xf32> to vector<2x128xbf16>
    %cst_16 = arith.constant dense<0.000000e+00> : vector<2x512xf32>
    %61 = tpu.matmul %60, %0, %cst_16 {dimension_numbers = #tpu.dot_dimension_numbers<[1], [0], [0], [1], [0, 0, 1, 1], [], []>} : vector<2x128xbf16>, vector<128x512xbf16>, vector<2x512xf32> -> vector<2x512xf32>
    %62 = arith.index_cast %c2_i32 : i32 to index
    %c0_17 = arith.constant 0 : index
    %c0_18 = arith.constant 0 : index
    %63 = vector.load %arg0[%62, %c0_17, %c0_18] : memref<8x2x512xf32, #tpu.memory_space<vmem>>, vector<1x2x512xf32>
    %64 = vector.shape_cast %63 : vector<1x2x512xf32> to vector<2x512xf32>
    %65 = arith.addf %64, %61 : vector<2x512xf32>
    %66 = arith.negf %65 : vector<2x512xf32>
    %67 = math.exp %66 : vector<2x512xf32>
    %cst_19 = arith.constant 1.000000e+00 : f32
    %68 = vector.broadcast %cst_19 : f32 to vector<2x512xf32>
    %69 = arith.addf %68, %67 : vector<2x512xf32>
    %70 = arith.divf %68, %69 : vector<2x512xf32>
    %71 = vector.extract_strided_slice %70 {offsets = [0, 0], sizes = [2, 128], strides = [1, 1]} : vector<2x512xf32> to vector<2x128xf32>
    %72 = vector.extract_strided_slice %70 {offsets = [0, 128], sizes = [2, 128], strides = [1, 1]} : vector<2x512xf32> to vector<2x128xf32>
    %73 = vector.extract_strided_slice %70 {offsets = [0, 256], sizes = [2, 128], strides = [1, 1]} : vector<2x512xf32> to vector<2x128xf32>
    %cst_20 = arith.constant 2.000000e+00 : f32
    %74 = vector.broadcast %cst_20 : f32 to vector<2x128xf32>
    %75 = arith.mulf %74, %73 : vector<2x128xf32>
    %cst_21 = arith.constant 1.000000e+00 : f32
    %76 = vector.broadcast %cst_21 : f32 to vector<2x128xf32>
    %77 = arith.subf %75, %76 : vector<2x128xf32>
    %78 = vector.extract_strided_slice %70 {offsets = [0, 384], sizes = [2, 128], strides = [1, 1]} : vector<2x512xf32> to vector<2x128xf32>
    %79 = arith.mulf %72, %59 : vector<2x128xf32>
    %80 = arith.mulf %71, %77 : vector<2x128xf32>
    %81 = arith.addf %79, %80 : vector<2x128xf32>
    %82 = math.tanh %81 : vector<2x128xf32>
    %83 = arith.mulf %78, %82 : vector<2x128xf32>
    %84 = vector.broadcast %c2_i32 : i32 to vector<2x128xi32>
    %85 = arith.cmpi slt, %84, %1 : vector<2x128xi32>
    %86 = arith.select %85, %83, %58 : vector<2x128xi1>, vector<2x128xf32>
    %87 = arith.select %85, %81, %59 : vector<2x128xi1>, vector<2x128xf32>
    %c3_i32 = arith.constant 3 : i32
    %88 = arith.truncf %86 : vector<2x128xf32> to vector<2x128xbf16>
    %cst_22 = arith.constant dense<0.000000e+00> : vector<2x512xf32>
    %89 = tpu.matmul %88, %0, %cst_22 {dimension_numbers = #tpu.dot_dimension_numbers<[1], [0], [0], [1], [0, 0, 1, 1], [], []>} : vector<2x128xbf16>, vector<128x512xbf16>, vector<2x512xf32> -> vector<2x512xf32>
    %90 = arith.index_cast %c3_i32 : i32 to index
    %c0_23 = arith.constant 0 : index
    %c0_24 = arith.constant 0 : index
    %91 = vector.load %arg0[%90, %c0_23, %c0_24] : memref<8x2x512xf32, #tpu.memory_space<vmem>>, vector<1x2x512xf32>
    %92 = vector.shape_cast %91 : vector<1x2x512xf32> to vector<2x512xf32>
    %93 = arith.addf %92, %89 : vector<2x512xf32>
    %94 = arith.negf %93 : vector<2x512xf32>
    %95 = math.exp %94 : vector<2x512xf32>
    %cst_25 = arith.constant 1.000000e+00 : f32
    %96 = vector.broadcast %cst_25 : f32 to vector<2x512xf32>
    %97 = arith.addf %96, %95 : vector<2x512xf32>
    %98 = arith.divf %96, %97 : vector<2x512xf32>
    %99 = vector.extract_strided_slice %98 {offsets = [0, 0], sizes = [2, 128], strides = [1, 1]} : vector<2x512xf32> to vector<2x128xf32>
    %100 = vector.extract_strided_slice %98 {offsets = [0, 128], sizes = [2, 128], strides = [1, 1]} : vector<2x512xf32> to vector<2x128xf32>
    %101 = vector.extract_strided_slice %98 {offsets = [0, 256], sizes = [2, 128], strides = [1, 1]} : vector<2x512xf32> to vector<2x128xf32>
    %cst_26 = arith.constant 2.000000e+00 : f32
    %102 = vector.broadcast %cst_26 : f32 to vector<2x128xf32>
    %103 = arith.mulf %102, %101 : vector<2x128xf32>
    %cst_27 = arith.constant 1.000000e+00 : f32
    %104 = vector.broadcast %cst_27 : f32 to vector<2x128xf32>
    %105 = arith.subf %103, %104 : vector<2x128xf32>
    %106 = vector.extract_strided_slice %98 {offsets = [0, 384], sizes = [2, 128], strides = [1, 1]} : vector<2x512xf32> to vector<2x128xf32>
    %107 = arith.mulf %100, %87 : vector<2x128xf32>
    %108 = arith.mulf %99, %105 : vector<2x128xf32>
    %109 = arith.addf %107, %108 : vector<2x128xf32>
    %110 = math.tanh %109 : vector<2x128xf32>
    %111 = arith.mulf %106, %110 : vector<2x128xf32>
    %112 = vector.broadcast %c3_i32 : i32 to vector<2x128xi32>
    %113 = arith.cmpi slt, %112, %1 : vector<2x128xi32>
    %114 = arith.select %113, %111, %86 : vector<2x128xi1>, vector<2x128xf32>
    %115 = arith.select %113, %109, %87 : vector<2x128xi1>, vector<2x128xf32>
    %c4_i32 = arith.constant 4 : i32
    %116 = arith.truncf %114 : vector<2x128xf32> to vector<2x128xbf16>
    %cst_28 = arith.constant dense<0.000000e+00> : vector<2x512xf32>
    %117 = tpu.matmul %116, %0, %cst_28 {dimension_numbers = #tpu.dot_dimension_numbers<[1], [0], [0], [1], [0, 0, 1, 1], [], []>} : vector<2x128xbf16>, vector<128x512xbf16>, vector<2x512xf32> -> vector<2x512xf32>
    %118 = arith.index_cast %c4_i32 : i32 to index
    %c0_29 = arith.constant 0 : index
    %c0_30 = arith.constant 0 : index
    %119 = vector.load %arg0[%118, %c0_29, %c0_30] : memref<8x2x512xf32, #tpu.memory_space<vmem>>, vector<1x2x512xf32>
    %120 = vector.shape_cast %119 : vector<1x2x512xf32> to vector<2x512xf32>
    %121 = arith.addf %120, %117 : vector<2x512xf32>
    %122 = arith.negf %121 : vector<2x512xf32>
    %123 = math.exp %122 : vector<2x512xf32>
    %cst_31 = arith.constant 1.000000e+00 : f32
    %124 = vector.broadcast %cst_31 : f32 to vector<2x512xf32>
    %125 = arith.addf %124, %123 : vector<2x512xf32>
    %126 = arith.divf %124, %125 : vector<2x512xf32>
    %127 = vector.extract_strided_slice %126 {offsets = [0, 0], sizes = [2, 128], strides = [1, 1]} : vector<2x512xf32> to vector<2x128xf32>
    %128 = vector.extract_strided_slice %126 {offsets = [0, 128], sizes = [2, 128], strides = [1, 1]} : vector<2x512xf32> to vector<2x128xf32>
    %129 = vector.extract_strided_slice %126 {offsets = [0, 256], sizes = [2, 128], strides = [1, 1]} : vector<2x512xf32> to vector<2x128xf32>
    %cst_32 = arith.constant 2.000000e+00 : f32
    %130 = vector.broadcast %cst_32 : f32 to vector<2x128xf32>
    %131 = arith.mulf %130, %129 : vector<2x128xf32>
    %cst_33 = arith.constant 1.000000e+00 : f32
    %132 = vector.broadcast %cst_33 : f32 to vector<2x128xf32>
    %133 = arith.subf %131, %132 : vector<2x128xf32>
    %134 = vector.extract_strided_slice %126 {offsets = [0, 384], sizes = [2, 128], strides = [1, 1]} : vector<2x512xf32> to vector<2x128xf32>
    %135 = arith.mulf %128, %115 : vector<2x128xf32>
    %136 = arith.mulf %127, %133 : vector<2x128xf32>
    %137 = arith.addf %135, %136 : vector<2x128xf32>
    %138 = math.tanh %137 : vector<2x128xf32>
    %139 = arith.mulf %134, %138 : vector<2x128xf32>
    %140 = vector.broadcast %c4_i32 : i32 to vector<2x128xi32>
    %141 = arith.cmpi slt, %140, %1 : vector<2x128xi32>
    %142 = arith.select %141, %139, %114 : vector<2x128xi1>, vector<2x128xf32>
    %143 = arith.select %141, %137, %115 : vector<2x128xi1>, vector<2x128xf32>
    %c5_i32 = arith.constant 5 : i32
    %144 = arith.truncf %142 : vector<2x128xf32> to vector<2x128xbf16>
    %cst_34 = arith.constant dense<0.000000e+00> : vector<2x512xf32>
    %145 = tpu.matmul %144, %0, %cst_34 {dimension_numbers = #tpu.dot_dimension_numbers<[1], [0], [0], [1], [0, 0, 1, 1], [], []>} : vector<2x128xbf16>, vector<128x512xbf16>, vector<2x512xf32> -> vector<2x512xf32>
    %146 = arith.index_cast %c5_i32 : i32 to index
    %c0_35 = arith.constant 0 : index
    %c0_36 = arith.constant 0 : index
    %147 = vector.load %arg0[%146, %c0_35, %c0_36] : memref<8x2x512xf32, #tpu.memory_space<vmem>>, vector<1x2x512xf32>
    %148 = vector.shape_cast %147 : vector<1x2x512xf32> to vector<2x512xf32>
    %149 = arith.addf %148, %145 : vector<2x512xf32>
    %150 = arith.negf %149 : vector<2x512xf32>
    %151 = math.exp %150 : vector<2x512xf32>
    %cst_37 = arith.constant 1.000000e+00 : f32
    %152 = vector.broadcast %cst_37 : f32 to vector<2x512xf32>
    %153 = arith.addf %152, %151 : vector<2x512xf32>
    %154 = arith.divf %152, %153 : vector<2x512xf32>
    %155 = vector.extract_strided_slice %154 {offsets = [0, 0], sizes = [2, 128], strides = [1, 1]} : vector<2x512xf32> to vector<2x128xf32>
    %156 = vector.extract_strided_slice %154 {offsets = [0, 128], sizes = [2, 128], strides = [1, 1]} : vector<2x512xf32> to vector<2x128xf32>
    %157 = vector.extract_strided_slice %154 {offsets = [0, 256], sizes = [2, 128], strides = [1, 1]} : vector<2x512xf32> to vector<2x128xf32>
    %cst_38 = arith.constant 2.000000e+00 : f32
    %158 = vector.broadcast %cst_38 : f32 to vector<2x128xf32>
    %159 = arith.mulf %158, %157 : vector<2x128xf32>
    %cst_39 = arith.constant 1.000000e+00 : f32
    %160 = vector.broadcast %cst_39 : f32 to vector<2x128xf32>
    %161 = arith.subf %159, %160 : vector<2x128xf32>
    %162 = vector.extract_strided_slice %154 {offsets = [0, 384], sizes = [2, 128], strides = [1, 1]} : vector<2x512xf32> to vector<2x128xf32>
    %163 = arith.mulf %156, %143 : vector<2x128xf32>
    %164 = arith.mulf %155, %161 : vector<2x128xf32>
    %165 = arith.addf %163, %164 : vector<2x128xf32>
    %166 = math.tanh %165 : vector<2x128xf32>
    %167 = arith.mulf %162, %166 : vector<2x128xf32>
    %168 = vector.broadcast %c5_i32 : i32 to vector<2x128xi32>
    %169 = arith.cmpi slt, %168, %1 : vector<2x128xi32>
    %170 = arith.select %169, %167, %142 : vector<2x128xi1>, vector<2x128xf32>
    %171 = arith.select %169, %165, %143 : vector<2x128xi1>, vector<2x128xf32>
    %c6_i32 = arith.constant 6 : i32
    %172 = arith.truncf %170 : vector<2x128xf32> to vector<2x128xbf16>
    %cst_40 = arith.constant dense<0.000000e+00> : vector<2x512xf32>
    %173 = tpu.matmul %172, %0, %cst_40 {dimension_numbers = #tpu.dot_dimension_numbers<[1], [0], [0], [1], [0, 0, 1, 1], [], []>} : vector<2x128xbf16>, vector<128x512xbf16>, vector<2x512xf32> -> vector<2x512xf32>
    %174 = arith.index_cast %c6_i32 : i32 to index
    %c0_41 = arith.constant 0 : index
    %c0_42 = arith.constant 0 : index
    %175 = vector.load %arg0[%174, %c0_41, %c0_42] : memref<8x2x512xf32, #tpu.memory_space<vmem>>, vector<1x2x512xf32>
    %176 = vector.shape_cast %175 : vector<1x2x512xf32> to vector<2x512xf32>
    %177 = arith.addf %176, %173 : vector<2x512xf32>
    %178 = arith.negf %177 : vector<2x512xf32>
    %179 = math.exp %178 : vector<2x512xf32>
    %cst_43 = arith.constant 1.000000e+00 : f32
    %180 = vector.broadcast %cst_43 : f32 to vector<2x512xf32>
    %181 = arith.addf %180, %179 : vector<2x512xf32>
    %182 = arith.divf %180, %181 : vector<2x512xf32>
    %183 = vector.extract_strided_slice %182 {offsets = [0, 0], sizes = [2, 128], strides = [1, 1]} : vector<2x512xf32> to vector<2x128xf32>
    %184 = vector.extract_strided_slice %182 {offsets = [0, 128], sizes = [2, 128], strides = [1, 1]} : vector<2x512xf32> to vector<2x128xf32>
    %185 = vector.extract_strided_slice %182 {offsets = [0, 256], sizes = [2, 128], strides = [1, 1]} : vector<2x512xf32> to vector<2x128xf32>
    %cst_44 = arith.constant 2.000000e+00 : f32
    %186 = vector.broadcast %cst_44 : f32 to vector<2x128xf32>
    %187 = arith.mulf %186, %185 : vector<2x128xf32>
    %cst_45 = arith.constant 1.000000e+00 : f32
    %188 = vector.broadcast %cst_45 : f32 to vector<2x128xf32>
    %189 = arith.subf %187, %188 : vector<2x128xf32>
    %190 = vector.extract_strided_slice %182 {offsets = [0, 384], sizes = [2, 128], strides = [1, 1]} : vector<2x512xf32> to vector<2x128xf32>
    %191 = arith.mulf %184, %171 : vector<2x128xf32>
    %192 = arith.mulf %183, %189 : vector<2x128xf32>
    %193 = arith.addf %191, %192 : vector<2x128xf32>
    %194 = math.tanh %193 : vector<2x128xf32>
    %195 = arith.mulf %190, %194 : vector<2x128xf32>
    %196 = vector.broadcast %c6_i32 : i32 to vector<2x128xi32>
    %197 = arith.cmpi slt, %196, %1 : vector<2x128xi32>
    %198 = arith.select %197, %195, %170 : vector<2x128xi1>, vector<2x128xf32>
    %199 = arith.select %197, %193, %171 : vector<2x128xi1>, vector<2x128xf32>
    %c7_i32 = arith.constant 7 : i32
    %200 = arith.truncf %198 : vector<2x128xf32> to vector<2x128xbf16>
    %cst_46 = arith.constant dense<0.000000e+00> : vector<2x512xf32>
    %201 = tpu.matmul %200, %0, %cst_46 {dimension_numbers = #tpu.dot_dimension_numbers<[1], [0], [0], [1], [0, 0, 1, 1], [], []>} : vector<2x128xbf16>, vector<128x512xbf16>, vector<2x512xf32> -> vector<2x512xf32>
    %202 = arith.index_cast %c7_i32 : i32 to index
    %c0_47 = arith.constant 0 : index
    %c0_48 = arith.constant 0 : index
    %203 = vector.load %arg0[%202, %c0_47, %c0_48] : memref<8x2x512xf32, #tpu.memory_space<vmem>>, vector<1x2x512xf32>
    %204 = vector.shape_cast %203 : vector<1x2x512xf32> to vector<2x512xf32>
    %205 = arith.addf %204, %201 : vector<2x512xf32>
    %206 = arith.negf %205 : vector<2x512xf32>
    %207 = math.exp %206 : vector<2x512xf32>
    %cst_49 = arith.constant 1.000000e+00 : f32
    %208 = vector.broadcast %cst_49 : f32 to vector<2x512xf32>
    %209 = arith.addf %208, %207 : vector<2x512xf32>
    %210 = arith.divf %208, %209 : vector<2x512xf32>
    %211 = vector.extract_strided_slice %210 {offsets = [0, 0], sizes = [2, 128], strides = [1, 1]} : vector<2x512xf32> to vector<2x128xf32>
    %212 = vector.extract_strided_slice %210 {offsets = [0, 128], sizes = [2, 128], strides = [1, 1]} : vector<2x512xf32> to vector<2x128xf32>
    %213 = vector.extract_strided_slice %210 {offsets = [0, 256], sizes = [2, 128], strides = [1, 1]} : vector<2x512xf32> to vector<2x128xf32>
    %cst_50 = arith.constant 2.000000e+00 : f32
    %214 = vector.broadcast %cst_50 : f32 to vector<2x128xf32>
    %215 = arith.mulf %214, %213 : vector<2x128xf32>
    %cst_51 = arith.constant 1.000000e+00 : f32
    %216 = vector.broadcast %cst_51 : f32 to vector<2x128xf32>
    %217 = arith.subf %215, %216 : vector<2x128xf32>
    %218 = vector.extract_strided_slice %210 {offsets = [0, 384], sizes = [2, 128], strides = [1, 1]} : vector<2x512xf32> to vector<2x128xf32>
    %219 = arith.mulf %212, %199 : vector<2x128xf32>
    %220 = arith.mulf %211, %217 : vector<2x128xf32>
    %221 = arith.addf %219, %220 : vector<2x128xf32>
    %222 = math.tanh %221 : vector<2x128xf32>
    %223 = arith.mulf %218, %222 : vector<2x128xf32>
    %224 = vector.broadcast %c7_i32 : i32 to vector<2x128xi32>
    %225 = arith.cmpi slt, %224, %1 : vector<2x128xi32>
    %226 = arith.select %225, %223, %198 : vector<2x128xi1>, vector<2x128xf32>
    %227 = arith.select %225, %221, %199 : vector<2x128xi1>, vector<2x128xf32>
    %c8_i32 = arith.constant 8 : i32
    %c0_52 = arith.constant 0 : index
    %c0_53 = arith.constant 0 : index
    %228 = vector.load %arg3[%c0_52, %c0_53] : memref<2x128xf32, #tpu.memory_space<vmem>>, vector<2x128xf32>
    tpu.vector_store %arg3[%c0_52, %c0_53], %226 {strides = array<i32>} : memref<2x128xf32, #tpu.memory_space<vmem>>, vector<2x128xf32>,
    return
  }
}

</mosaic_0001>

<bundles_post_ra>
// kernel: rnn_forward.1
= control target key start
LH: loop header
LB: loop body
LE: loop exit
PB: predicated region body
PF: predicated region fallthrough
CT: control target
= control target key end

     0   :  { %v1430_v1 = vmov 0   ;;  %v1431_v33 = vmov 1983009808   ;;  %v300_v35 = vlaneseq  ;;  %s2031_s1 = inlined_call_operand.vmem [shape: bf16[128,512], index: 1, kind: input, shape index: {}]   ;;  %s2032_s0 = inlined_call_operand.vmem [shape: f32[8,2,512], index: 0, kind: input, shape index: {}]   ;;  %s2033_s2 = inlined_call_operand.vmem [shape: s32[2,128], index: 2, kind: input, shape index: {}]   ;;  %s2034_s3 = inlined_call_operand.vmem [shape: f32[2,128], index: 3, kind: output, shape index: {}]  }
   0x1   :  { %v1455_v0 = vld [vmem:[%s2031_s1 + $0x4] ss:$16 sps:$4 sm:$0xff]   ;;  %240 = vmatprep.mubr.bf16.mxu0 %v1430_v1  ;;  %281 = vmatprep.mubr.bf16.mxu1 %v1430_v1  ;;  %v1462_v2 = vld [vmem:[%s2031_s1 + $0xc] ss:$16 sps:$4 sm:$0xff]   ;;  %v1468_v3 = vld [vmem:[%s2031_s1] ss:$16 sps:$4 sm:$0xff]   ;;  %v298_v34 = vunpack.c.l.s4 %v1431_v33 }
   0x2   :  { %208 = vmatprep.subr.bf16.mxu0 %v1455_v0  ;;  %v1473_v4 = vld [vmem:[%s2031_s1 + $0x8] ss:$16 sps:$4 sm:$0xff]   ;;  %249 = vmatprep.subr.bf16.mxu1 %v1462_v2  ;;  %v1479_v5 = vld [vmem:[%s2031_s1 + $0x24] ss:$16 sps:$4 sm:$0xff]   ;;  %v1486_v6 = vld [vmem:[%s2031_s1 + $0x2c] ss:$16 sps:$4 sm:$0xff]  }
   0x3   :  { %209 = vmatpush1.bf16.msra.mxu0 %v1468_v3  ;;  %250 = vmatpush1.bf16.msra.mxu1 %v1473_v4  ;;  %v1491_v7 = vld [vmem:[%s2031_s1 + $0x20] ss:$16 sps:$4 sm:$0xff]   ;;  %v1497_v8 = vld [vmem:[%s2031_s1 + $0x28] ss:$16 sps:$4 sm:$0xff]   ;;  %v1503_v9 = vld [vmem:[%s2031_s1 + $0x44] ss:$16 sps:$4 sm:$0xff]   ;;  %v299_v36 = vunpack.c.0.s8 %v298_v34 }
   0x4   :  { %210 = vmatprep.subr.bf16.mxu0 %v1479_v5  ;;  %251 = vmatprep.subr.bf16.mxu1 %v1486_v6  ;;  %v1508_v10 = vld [vmem:[%s2031_s1 + $0x4c] ss:$16 sps:$4 sm:$0xff]   ;;  %v1513_v11 = vld [vmem:[%s2031_s1 + $0x40] ss:$16 sps:$4 sm:$0xff]   ;;  %v1518_v12 = vld [vmem:[%s2031_s1 + $0x48] ss:$16 sps:$4 sm:$0xff]  }
   0x5   :  { %v1525_v13 = vld [vmem:[%s2031_s1 + $0x64] ss:$16 sps:$4 sm:$0xff]   ;;  %v1532_v14 = vld [vmem:[%s2031_s1 + $0x6c] ss:$16 sps:$4 sm:$0xff]   ;;  %v1537_v15 = vld [vmem:[%s2031_s1 + $0x60] ss:$16 sps:$4 sm:$0xff]  }
   0x6   :  { %v1544_v16 = vld [vmem:[%s2031_s1 + $0x68] ss:$16 sps:$4 sm:$0xff]   ;;  %v1549_v17 = vld [vmem:[%s2031_s1 + $0x84] ss:$16 sps:$4 sm:$0xff]   ;;  %v1556_v18 = vld [vmem:[%s2031_s1 + $0x8c] ss:$16 sps:$4 sm:$0xff]  }
   0x7   :  { %211 = vmatpush1.bf16.msra.mxu0 %v1491_v7  ;;  %252 = vmatpush1.bf16.msra.mxu1 %v1497_v8  ;;  %v1561_v19 = vld [vmem:[%s2031_s1 + $0x80] ss:$16 sps:$4 sm:$0xff]   ;;  %v1566_v20 = vld [vmem:[%s2031_s1 + $0x88] ss:$16 sps:$4 sm:$0xff]   ;;  %v1573_v21 = vld [vmem:[%s2031_s1 + $0xa4] ss:$16 sps:$4 sm:$0xff]  }
   0x8   :  { %212 = vmatprep.subr.bf16.mxu0 %v1503_v9  ;;  %253 = vmatprep.subr.bf16.mxu1 %v1508_v10  ;;  %v1580_v22 = vld [vmem:[%s2031_s1 + $0xac] ss:$16 sps:$4 sm:$0xff]   ;;  %v1587_v23 = vld [vmem:[%s2031_s1 + $0xa0] ss:$16 sps:$4 sm:$0xff]   ;;  %v1592_v24 = vld [vmem:[%s2031_s1 + $0xa8] ss:$16 sps:$4 sm:$0xff]  }
   0x9   :  { %v1599_v25 = vld [vmem:[%s2031_s1 + $0xc4] ss:$16 sps:$4 sm:$0xff]   ;;  %v1604_v26 = vld [vmem:[%s2031_s1 + $0xcc] ss:$16 sps:$4 sm:$0xff]   ;;  %v1611_v27 = vld [vmem:[%s2031_s1 + $0xc0] ss:$16 sps:$4 sm:$0xff]  }
   0xa   :  { %v1616_v28 = vld [vmem:[%s2031_s1 + $0xc8] ss:$16 sps:$4 sm:$0xff]   ;;  %v1623_v29 = vld [vmem:[%s2031_s1 + $0xe4] ss:$16 sps:$4 sm:$0xff]   ;;  %v1628_v30 = vld [vmem:[%s2031_s1 + $0xec] ss:$16 sps:$4 sm:$0xff]  }
   0xb   :  { %213 = vmatpush1.bf16.msra.mxu0 %v1513_v11  ;;  %254 = vmatpush1.bf16.msra.mxu1 %v1518_v12  ;;  %v1635_v31 = vld [vmem:[%s2031_s1 + $0xe0] ss:$16 sps:$4 sm:$0xff]   ;;  %v1640_v32 = vld [vmem:[%s2031_s1 + $0xe8] ss:$16 sps:$4 sm:$0xff]   ;;  %v301_v37 = vshrl.u32 %v300_v35, 7 }
   0xc   :  { %214 = vmatprep.subr.bf16.mxu0 %v1525_v13  ;;  %255 = vmatprep.subr.bf16.mxu1 %v1532_v14  ;;  %v290_v51 = vld [vmem:[%s2032_s0] sm:$0xff] }
   0xd   :  { %v1684_v40 = vsub.s32 %v299_v36, %v301_v37  ;;  %v1697_v34 = vld [vmem:[%s2033_s2] sm:$0x3] }
   0xe   :  { %vm334_vm0 = vcmp.gt.s32.totalorder %v1697_v34, 0  ;;  %vm465_vm2 = vcmp.gt.s32.totalorder %v1697_v34, 1  ;;  %vm596_vm3 = vcmp.gt.s32.totalorder %v1697_v34, 2  ;;  %vm727_vm4 = vcmp.gt.s32.totalorder %v1697_v34, 3 }
   0xf   :  { %215 = vmatpush1.bf16.msra.mxu0 %v1537_v15  ;;  %256 = vmatpush1.bf16.msra.mxu1 %v1544_v16  ;;  %vm1292_vm1 = vmpackc.low %vm334_vm0, %vm334_vm0  ;;  %vm858_vm5 = vcmp.gt.s32.totalorder %v1697_v34, 4  ;;  %vm989_vm6 = vcmp.gt.s32.totalorder %v1697_v34, 5  ;;  %vm1120_vm7 = vcmp.gt.s32.totalorder %v1697_v34, 6  ;;  %vm1251_vm8 = vcmp.gt.s32.totalorder %v1697_v34, 7 }
  0x10   :  { %216 = vmatprep.subr.bf16.mxu0 %v1549_v17  ;;  %257 = vmatprep.subr.bf16.mxu1 %v1556_v18 }
  0x13   :  { %217 = vmatpush1.bf16.msra.mxu0 %v1561_v19  ;;  %258 = vmatpush1.bf16.msra.mxu1 %v1566_v20 }
  0x14   :  { %218 = vmatprep.subr.bf16.mxu0 %v1573_v21  ;;  %259 = vmatprep.subr.bf16.mxu1 %v1580_v22 }
  0x17   :  { %219 = vmatpush1.bf16.msra.mxu0 %v1587_v23  ;;  %260 = vmatpush1.bf16.msra.mxu1 %v1592_v24 }
  0x18   :  { %220 = vmatprep.subr.bf16.mxu0 %v1599_v25  ;;  %261 = vmatprep.subr.bf16.mxu1 %v1604_v26 }
  0x1b   :  { %221 = vmatpush1.bf16.msra.mxu0 %v1611_v27  ;;  %262 = vmatpush1.bf16.msra.mxu1 %v1616_v28 }
  0x1c   :  { %222 = vmatprep.subr.bf16.mxu0 %v1623_v29  ;;  %263 = vmatprep.subr.bf16.mxu1 %v1628_v30 }
  0x1f   :  { %223 = vmatpush1.bf16.msra.mxu0 %v1635_v31  ;;  %264 = vmatpush1.bf16.msra.mxu1 %v1640_v32 }
  0x20   :  { %338 = vmatprep.subr.bf16.mxu0 %v1455_v0  ;;  %379 = vmatprep.subr.bf16.mxu1 %v1462_v2 }
  0x22   :  { %241 = vmatmul.mubr.bf16.vlgmr.msra.gmra.mrb[0].mxu0 %v1430_v1  ;;  %282 = vmatmul.mubr.bf16.vlgmr.msra.gmra.mrb[0].mxu1 %v1430_v1 }
  0x23   :  { %339 = vmatpush1.bf16.msra.mxu0 %v1468_v3  ;;  %380 = vmatpush1.bf16.msra.mxu1 %v1473_v4 }
  0x24   :  { %340 = vmatprep.subr.bf16.mxu0 %v1479_v5  ;;  %381 = vmatprep.subr.bf16.mxu1 %v1486_v6 }
  0x25   :  { %370 = vmatprep.mubr.bf16.mxu0 %v1430_v1  ;;  %411 = vmatprep.mubr.bf16.mxu1 %v1430_v1 }
  0x27   :  { %341 = vmatpush1.bf16.msra.mxu0 %v1491_v7  ;;  %382 = vmatpush1.bf16.msra.mxu1 %v1497_v8 }
  0x28   :  { %342 = vmatprep.subr.bf16.mxu0 %v1503_v9  ;;  %383 = vmatprep.subr.bf16.mxu1 %v1508_v10 }
  0x2b   :  { %343 = vmatpush1.bf16.msra.mxu0 %v1513_v11  ;;  %384 = vmatpush1.bf16.msra.mxu1 %v1518_v12 }
  0x2c   :  { %344 = vmatprep.subr.bf16.mxu0 %v1525_v13  ;;  %385 = vmatprep.subr.bf16.mxu1 %v1532_v14 }
  0x2f   :  { %345 = vmatpush1.bf16.msra.mxu0 %v1537_v15  ;;  %386 = vmatpush1.bf16.msra.mxu1 %v1544_v16 }
  0x30   :  { %346 = vmatprep.subr.bf16.mxu0 %v1549_v17  ;;  %387 = vmatprep.subr.bf16.mxu1 %v1556_v18 }
  0x33   :  { %347 = vmatpush1.bf16.msra.mxu0 %v1561_v19  ;;  %388 = vmatpush1.bf16.msra.mxu1 %v1566_v20 }
  0x34   :  { %348 = vmatprep.subr.bf16.mxu0 %v1573_v21  ;;  %389 = vmatprep.subr.bf16.mxu1 %v1580_v22 }
  0x37   :  { %349 = vmatpush1.bf16.msra.mxu0 %v1587_v23  ;;  %390 = vmatpush1.bf16.msra.mxu1 %v1592_v24 }
  0x38   :  { %350 = vmatprep.subr.bf16.mxu0 %v1599_v25  ;;  %391 = vmatprep.subr.bf16.mxu1 %v1604_v26 }
  0x3b   :  { %351 = vmatpush1.bf16.msra.mxu0 %v1611_v27  ;;  %392 = vmatpush1.bf16.msra.mxu1 %v1616_v28 }
  0x3c   :  { %352 = vmatprep.subr.bf16.mxu0 %v1623_v29  ;;  %393 = vmatprep.subr.bf16.mxu1 %v1628_v30 }
  0x3f   :  { %353 = vmatpush1.bf16.msra.mxu0 %v1635_v31  ;;  %394 = vmatpush1.bf16.msra.mxu1 %v1640_v32 }
  0x40   :  { %469 = vmatprep.subr.bf16.mxu0 %v1455_v0  ;;  %510 = vmatprep.subr.bf16.mxu1 %v1462_v2 }
  0xf5   :  { %v242_v38 = vpop.f32.mrb[0].mxu0  ;;  %v283_v39 = vpop.f32.mrb[0].mxu1 }
  0xf6   :  { %v244_v41 = vpop.f32.mrb[1].mxu0  ;;  %v285_v42 = vpop.f32.mrb[1].mxu1 }
  0xf7   :  { %v295_v43 = vcombine.low %v242_v38, %v244_v41  ;;  %v296_v44 = vcombine.low %v283_v39, %v285_v42  ;;  %v246_v45 = vpop.f32.mrb[2].mxu0  ;;  %v287_v46 = vpop.f32.mrb[2].mxu1 }
  0xf8   :  { %v247_v47 = vpop.f32.mrb[3].mxu0  ;;  %v288_v48 = vpop.f32.mrb[3].mxu1 }
  0xf9   :  { %v303_v49 = vrot.slane %v295_v43, %v1684_v40  ;;  %v310_v50 = vrot.slane %v296_v44, %v1684_v40 }
  0xfb   :  { %v311_v52 = vcombine.low %v303_v49, %v310_v50 }
  0xfd   :  { %v313_v53 = vadd.f32 %v311_v52, %v290_v51  ;;  %v1298_v52 = vld [vmem:[%s2032_s0 + $0x8] sm:$0xff] }
  0xff   :  { %v1290_v54 = vmul.f32 -1.442695, %v313_v53 }
 0x101   :  { %1369 = vpow2.f32 %v1290_v54 }
 0x10b   :  { %v1370_v55 = vpop.eup %1369 }
 0x10c   :  { %v317_v56 = vadd.f32 1.0, %v1370_v55 }
 0x10e   :  { %1371 = vrcp.f32 %v317_v56 }
 0x118   :  { %v1372_v57 = vpop.eup %1371 }
 0x119   :  { %v321_v58 = vrot.slane %v1372_v57, 4  ;;  %v325_v60 = vrot.slane %v1372_v57, 2  ;;  %v331_v35 = vrot.slane %v1372_v57, 6 }
 0x11b   :  { %v323_v59 = vmul.f32 2.0, %v321_v58  ;;  %v327_v62 = vmul.f32 0.0, %v325_v60 }
 0x11d   :  { %v1291_v61 = vadd.f32 -1.0, %v323_v59 }
 0x11f   :  { %v328_v63 = vmul.f32 %v1372_v57, %v1291_v61 }
 0x121   :  { %v1691_v33 = vadd.f32 %v328_v63, %v327_v62 }
 0x123   :  { %1373 = vtanh.f32 %v1691_v33  ;;  %v336_v61 = vsel %vm334_vm0, %v1691_v33, 0.0 }
 0x12d   :  { %v1374_v36 = vpop.eup %1373 }
 0x12e   :  { %v1699_v37 = vmul.f32 %v1374_v36, %v331_v35 }
 0x130   :  { %v1293_v38 = vpack.c.bf16 %v1699_v37, %v1699_v37 }
 0x132   :  { %1294 = vmatmul.mubr.msk.bf16.vlgmr.msra.gmra.mrb[4].mxu0 %vm1292_vm1, %v1293_v38  ;;  %1297 = vmatmul.mubr.msk.bf16.vlgmr.msra.gmra.mrb[4].mxu1 %vm1292_vm1, %v1293_v38 }
 0x133   :  { %470 = vmatpush1.bf16.msra.mxu0 %v1468_v3  ;;  %511 = vmatpush1.bf16.msra.mxu1 %v1473_v4 }
 0x134   :  { %471 = vmatprep.subr.bf16.mxu0 %v1479_v5  ;;  %512 = vmatprep.subr.bf16.mxu1 %v1486_v6 }
 0x135   :  { %501 = vmatprep.mubr.bf16.mxu0 %v1430_v1  ;;  %542 = vmatprep.mubr.bf16.mxu1 %v1430_v1 }
 0x137   :  { %472 = vmatpush1.bf16.msra.mxu0 %v1491_v7  ;;  %513 = vmatpush1.bf16.msra.mxu1 %v1497_v8 }
 0x138   :  { %473 = vmatprep.subr.bf16.mxu0 %v1503_v9  ;;  %514 = vmatprep.subr.bf16.mxu1 %v1508_v10 }
 0x13b   :  { %474 = vmatpush1.bf16.msra.mxu0 %v1513_v11  ;;  %515 = vmatpush1.bf16.msra.mxu1 %v1518_v12 }
 0x13c   :  { %475 = vmatprep.subr.bf16.mxu0 %v1525_v13  ;;  %516 = vmatprep.subr.bf16.mxu1 %v1532_v14 }
 0x13f   :  { %476 = vmatpush1.bf16.msra.mxu0 %v1537_v15  ;;  %517 = vmatpush1.bf16.msra.mxu1 %v1544_v16 }
 0x140   :  { %477 = vmatprep.subr.bf16.mxu0 %v1549_v17  ;;  %518 = vmatprep.subr.bf16.mxu1 %v1556_v18 }
 0x143   :  { %478 = vmatpush1.bf16.msra.mxu0 %v1561_v19  ;;  %519 = vmatpush1.bf16.msra.mxu1 %v1566_v20 }
 0x144   :  { %479 = vmatprep.subr.bf16.mxu0 %v1573_v21  ;;  %520 = vmatprep.subr.bf16.mxu1 %v1580_v22 }
 0x147   :  { %480 = vmatpush1.bf16.msra.mxu0 %v1587_v23  ;;  %521 = vmatpush1.bf16.msra.mxu1 %v1592_v24 }
 0x148   :  { %481 = vmatprep.subr.bf16.mxu0 %v1599_v25  ;;  %522 = vmatprep.subr.bf16.mxu1 %v1604_v26 }
 0x14b   :  { %482 = vmatpush1.bf16.msra.mxu0 %v1611_v27  ;;  %523 = vmatpush1.bf16.msra.mxu1 %v1616_v28 }
 0x14c   :  { %483 = vmatprep.subr.bf16.mxu0 %v1623_v29  ;;  %524 = vmatprep.subr.bf16.mxu1 %v1628_v30 }
 0x14f   :  { %484 = vmatpush1.bf16.msra.mxu0 %v1635_v31  ;;  %525 = vmatpush1.bf16.msra.mxu1 %v1640_v32 }
 0x150   :  { %600 = vmatprep.subr.bf16.mxu0 %v1455_v0  ;;  %641 = vmatprep.subr.bf16.mxu1 %v1462_v2 }
 0x205   :  { %v372_v39 = vpop.f32.mrb[4].mxu0  ;;  %v413_v41 = vpop.f32.mrb[4].mxu1 }
 0x206   :  { %v374_v42 = vpop.f32.mrb[5].mxu0  ;;  %v415_v43 = vpop.f32.mrb[5].mxu1 }
 0x207   :  { %v426_v44 = vcombine.low %v372_v39, %v374_v42  ;;  %v427_v45 = vcombine.low %v413_v41, %v415_v43  ;;  %v376_v46 = vpop.f32.mrb[6].mxu0  ;;  %v417_v47 = vpop.f32.mrb[6].mxu1 }
 0x208   :  { %v377_v48 = vpop.f32.mrb[7].mxu0  ;;  %v418_v49 = vpop.f32.mrb[7].mxu1 }
 0x209   :  { %v434_v50 = vrot.slane %v426_v44, %v1684_v40  ;;  %v441_v51 = vrot.slane %v427_v45, %v1684_v40  ;;  %v335_v44 = vsel %vm334_vm0, %v1699_v37, 0.0 }
 0x20b   :  { %v442_v53 = vcombine.low %v434_v50, %v441_v51 }
 0x20d   :  { %v444_v54 = vadd.f32 %v1298_v52, %v442_v53 }
 0x20f   :  { %v1299_v55 = vmul.f32 -1.442695, %v444_v54 }
 0x211   :  { %1375 = vpow2.f32 %v1299_v55 }
 0x21b   :  { %v1376_v56 = vpop.eup %1375 }
 0x21c   :  { %v448_v57 = vadd.f32 1.0, %v1376_v56 }
 0x21e   :  { %1377 = vrcp.f32 %v448_v57  ;;  %v1301_v57 = vld [vmem:[%s2032_s0 + $0x10] sm:$0xff] }
 0x228   :  { %v1378_v58 = vpop.eup %1377 }
 0x229   :  { %v452_v59 = vrot.slane %v1378_v58, 4  ;;  %v456_v60 = vrot.slane %v1378_v58, 2  ;;  %v462_v41 = vrot.slane %v1378_v58, 6 }
 0x22b   :  { %v454_v62 = vmul.f32 2.0, %v452_v59  ;;  %v458_v63 = vmul.f32 %v456_v60, %v336_v61 }
 0x22d   :  { %v1300_v35 = vadd.f32 -1.0, %v454_v62 }
 0x22f   :  { %v459_v36 = vmul.f32 %v1378_v58, %v1300_v35 }
 0x231   :  { %v460_v38 = vadd.f32 %v459_v36, %v458_v63 }
 0x233   :  { %1379 = vtanh.f32 %v460_v38  ;;  %v1750_v39 = vsel %vm465_vm2, %v460_v38, %v336_v61 }
 0x23d   :  { %v1380_v42 = vpop.eup %1379 }
 0x23e   :  { %v464_v43 = vmul.f32 %v1380_v42, %v462_v41 }
 0x240   :  { %v1755_v45 = vsel %vm465_vm2, %v464_v43, %v335_v44 }
 0x241   :  { %v468_v33 = vpack.c.bf16 %v1755_v45, %v1755_v45 }
 0x243   :  { %502 = vmatmul.mubr.bf16.vlgmr.msra.gmra.mrb[8].mxu0 %v468_v33  ;;  %543 = vmatmul.mubr.bf16.vlgmr.msra.gmra.mrb[8].mxu1 %v468_v33 }
 0x244   :  { %601 = vmatpush1.bf16.msra.mxu0 %v1468_v3  ;;  %642 = vmatpush1.bf16.msra.mxu1 %v1473_v4 }
 0x245   :  { %602 = vmatprep.subr.bf16.mxu0 %v1479_v5  ;;  %643 = vmatprep.subr.bf16.mxu1 %v1486_v6 }
 0x246   :  { %632 = vmatprep.mubr.bf16.mxu0 %v1430_v1  ;;  %673 = vmatprep.mubr.bf16.mxu1 %v1430_v1 }
 0x248   :  { %603 = vmatpush1.bf16.msra.mxu0 %v1491_v7  ;;  %644 = vmatpush1.bf16.msra.mxu1 %v1497_v8 }
 0x249   :  { %604 = vmatprep.subr.bf16.mxu0 %v1503_v9  ;;  %645 = vmatprep.subr.bf16.mxu1 %v1508_v10 }
 0x24c   :  { %605 = vmatpush1.bf16.msra.mxu0 %v1513_v11  ;;  %646 = vmatpush1.bf16.msra.mxu1 %v1518_v12 }
 0x24d   :  { %606 = vmatprep.subr.bf16.mxu0 %v1525_v13  ;;  %647 = vmatprep.subr.bf16.mxu1 %v1532_v14 }
 0x250   :  { %607 = vmatpush1.bf16.msra.mxu0 %v1537_v15  ;;  %648 = vmatpush1.bf16.msra.mxu1 %v1544_v16 }
 0x251   :  { %608 = vmatprep.subr.bf16.mxu0 %v1549_v17  ;;  %649 = vmatprep.subr.bf16.mxu1 %v1556_v18 }
 0x254   :  { %609 = vmatpush1.bf16.msra.mxu0 %v1561_v19  ;;  %650 = vmatpush1.bf16.msra.mxu1 %v1566_v20 }
 0x255   :  { %610 = vmatprep.subr.bf16.mxu0 %v1573_v21  ;;  %651 = vmatprep.subr.bf16.mxu1 %v1580_v22 }
 0x258   :  { %611 = vmatpush1.bf16.msra.mxu0 %v1587_v23  ;;  %652 = vmatpush1.bf16.msra.mxu1 %v1592_v24 }
 0x259   :  { %612 = vmatprep.subr.bf16.mxu0 %v1599_v25  ;;  %653 = vmatprep.subr.bf16.mxu1 %v1604_v26 }
 0x25c   :  { %613 = vmatpush1.bf16.msra.mxu0 %v1611_v27  ;;  %654 = vmatpush1.bf16.msra.mxu1 %v1616_v28 }
 0x25d   :  { %614 = vmatprep.subr.bf16.mxu0 %v1623_v29  ;;  %655 = vmatprep.subr.bf16.mxu1 %v1628_v30 }
 0x260   :  { %615 = vmatpush1.bf16.msra.mxu0 %v1635_v31  ;;  %656 = vmatpush1.bf16.msra.mxu1 %v1640_v32 }
 0x261   :  { %731 = vmatprep.subr.bf16.mxu0 %v1455_v0  ;;  %772 = vmatprep.subr.bf16.mxu1 %v1462_v2 }
 0x316   :  { %v503_v37 = vpop.f32.mrb[8].mxu0  ;;  %v544_v46 = vpop.f32.mrb[8].mxu1 }
 0x317   :  { %v505_v47 = vpop.f32.mrb[9].mxu0  ;;  %v546_v48 = vpop.f32.mrb[9].mxu1 }
 0x318   :  { %v557_v49 = vcombine.low %v503_v37, %v505_v47  ;;  %v558_v50 = vcombine.low %v544_v46, %v546_v48  ;;  %v507_v51 = vpop.f32.mrb[10].mxu0  ;;  %v548_v52 = vpop.f32.mrb[10].mxu1 }
 0x319   :  { %v508_v53 = vpop.f32.mrb[11].mxu0  ;;  %v549_v54 = vpop.f32.mrb[11].mxu1 }
 0x31a   :  { %v565_v55 = vrot.slane %v557_v49, %v1684_v40  ;;  %v572_v56 = vrot.slane %v558_v50, %v1684_v40 }
 0x31c   :  { %v573_v58 = vcombine.low %v565_v55, %v572_v56 }
 0x31e   :  { %v575_v59 = vadd.f32 %v1301_v57, %v573_v58 }
 0x320   :  { %v1302_v60 = vmul.f32 -1.442695, %v575_v59 }
 0x322   :  { %1381 = vpow2.f32 %v1302_v60  ;;  %v1304_v60 = vld [vmem:[%s2032_s0 + $0x18] sm:$0xff] }
 0x32c   :  { %v1382_v61 = vpop.eup %1381 }
 0x32d   :  { %v579_v62 = vadd.f32 1.0, %v1382_v61 }
 0x32f   :  { %1383 = vrcp.f32 %v579_v62 }
 0x339   :  { %v1384_v63 = vpop.eup %1383 }
 0x33a   :  { %v583_v35 = vrot.slane %v1384_v63, 4  ;;  %v587_v36 = vrot.slane %v1384_v63, 2  ;;  %v593_v37 = vrot.slane %v1384_v63, 6 }
 0x33c   :  { %v585_v38 = vmul.f32 2.0, %v583_v35  ;;  %v589_v41 = vmul.f32 %v587_v36, %v1750_v39 }
 0x33e   :  { %v1303_v42 = vadd.f32 -1.0, %v585_v38 }
 0x340   :  { %v590_v43 = vmul.f32 %v1384_v63, %v1303_v42 }
 0x342   :  { %v591_v44 = vadd.f32 %v590_v43, %v589_v41 }
 0x344   :  { %1385 = vtanh.f32 %v591_v44  ;;  %v1801_v33 = vsel %vm596_vm3, %v591_v44, %v1750_v39 }
 0x34e   :  { %v1386_v46 = vpop.eup %1385 }
 0x34f   :  { %v595_v47 = vmul.f32 %v1386_v46, %v593_v37 }
 0x351   :  { %v1804_v48 = vsel %vm596_vm3, %v595_v47, %v1755_v45 }
 0x352   :  { %v599_v49 = vpack.c.bf16 %v1804_v48, %v1804_v48 }
 0x354   :  { %633 = vmatmul.mubr.bf16.vlgmr.msra.gmra.mrb[12].mxu0 %v599_v49  ;;  %674 = vmatmul.mubr.bf16.vlgmr.msra.gmra.mrb[12].mxu1 %v599_v49 }
 0x355   :  { %732 = vmatpush1.bf16.msra.mxu0 %v1468_v3  ;;  %773 = vmatpush1.bf16.msra.mxu1 %v1473_v4 }
 0x356   :  { %733 = vmatprep.subr.bf16.mxu0 %v1479_v5  ;;  %774 = vmatprep.subr.bf16.mxu1 %v1486_v6 }
 0x357   :  { %763 = vmatprep.mubr.bf16.mxu0 %v1430_v1  ;;  %804 = vmatprep.mubr.bf16.mxu1 %v1430_v1 }
 0x359   :  { %734 = vmatpush1.bf16.msra.mxu0 %v1491_v7  ;;  %775 = vmatpush1.bf16.msra.mxu1 %v1497_v8 }
 0x35a   :  { %735 = vmatprep.subr.bf16.mxu0 %v1503_v9  ;;  %776 = vmatprep.subr.bf16.mxu1 %v1508_v10 }
 0x35d   :  { %736 = vmatpush1.bf16.msra.mxu0 %v1513_v11  ;;  %777 = vmatpush1.bf16.msra.mxu1 %v1518_v12 }
 0x35e   :  { %737 = vmatprep.subr.bf16.mxu0 %v1525_v13  ;;  %778 = vmatprep.subr.bf16.mxu1 %v1532_v14 }
 0x361   :  { %738 = vmatpush1.bf16.msra.mxu0 %v1537_v15  ;;  %779 = vmatpush1.bf16.msra.mxu1 %v1544_v16 }
 0x362   :  { %739 = vmatprep.subr.bf16.mxu0 %v1549_v17  ;;  %780 = vmatprep.subr.bf16.mxu1 %v1556_v18 }
 0x365   :  { %740 = vmatpush1.bf16.msra.mxu0 %v1561_v19  ;;  %781 = vmatpush1.bf16.msra.mxu1 %v1566_v20 }
 0x366   :  { %741 = vmatprep.subr.bf16.mxu0 %v1573_v21  ;;  %782 = vmatprep.subr.bf16.mxu1 %v1580_v22 }
 0x369   :  { %742 = vmatpush1.bf16.msra.mxu0 %v1587_v23  ;;  %783 = vmatpush1.bf16.msra.mxu1 %v1592_v24 }
 0x36a   :  { %743 = vmatprep.subr.bf16.mxu0 %v1599_v25  ;;  %784 = vmatprep.subr.bf16.mxu1 %v1604_v26 }
 0x36d   :  { %744 = vmatpush1.bf16.msra.mxu0 %v1611_v27  ;;  %785 = vmatpush1.bf16.msra.mxu1 %v1616_v28 }
 0x36e   :  { %745 = vmatprep.subr.bf16.mxu0 %v1623_v29  ;;  %786 = vmatprep.subr.bf16.mxu1 %v1628_v30 }
 0x371   :  { %746 = vmatpush1.bf16.msra.mxu0 %v1635_v31  ;;  %787 = vmatpush1.bf16.msra.mxu1 %v1640_v32 }
 0x372   :  { %862 = vmatprep.subr.bf16.mxu0 %v1455_v0  ;;  %903 = vmatprep.subr.bf16.mxu1 %v1462_v2 }
 0x427   :  { %v634_v39 = vpop.f32.mrb[12].mxu0  ;;  %v675_v45 = vpop.f32.mrb[12].mxu1 }
 0x428   :  { %v636_v50 = vpop.f32.mrb[13].mxu0  ;;  %v677_v51 = vpop.f32.mrb[13].mxu1 }
 0x429   :  { %v688_v52 = vcombine.low %v634_v39, %v636_v50  ;;  %v689_v53 = vcombine.low %v675_v45, %v677_v51  ;;  %v638_v54 = vpop.f32.mrb[14].mxu0  ;;  %v679_v55 = vpop.f32.mrb[14].mxu1 }
 0x42a   :  { %v639_v56 = vpop.f32.mrb[15].mxu0  ;;  %v680_v57 = vpop.f32.mrb[15].mxu1 }
 0x42b   :  { %v696_v58 = vrot.slane %v688_v52, %v1684_v40  ;;  %v703_v59 = vrot.slane %v689_v53, %v1684_v40 }
 0x42d   :  { %v704_v61 = vcombine.low %v696_v58, %v703_v59 }
 0x42f   :  { %v706_v62 = vadd.f32 %v1304_v60, %v704_v61 }
 0x431   :  { %v1305_v63 = vmul.f32 -1.442695, %v706_v62 }
 0x433   :  { %1387 = vpow2.f32 %v1305_v63  ;;  %v1307_v63 = vld [vmem:[%s2032_s0 + $0x20] sm:$0xff] }
 0x43d   :  { %v1388_v35 = vpop.eup %1387 }
 0x43e   :  { %v710_v36 = vadd.f32 1.0, %v1388_v35 }
 0x440   :  { %1389 = vrcp.f32 %v710_v36 }
 0x44a   :  { %v1390_v38 = vpop.eup %1389 }
 0x44b   :  { %v714_v41 = vrot.slane %v1390_v38, 4  ;;  %v718_v42 = vrot.slane %v1390_v38, 2  ;;  %v724_v39 = vrot.slane %v1390_v38, 6 }
 0x44d   :  { %v716_v43 = vmul.f32 2.0, %v714_v41  ;;  %v720_v44 = vmul.f32 %v718_v42, %v1801_v33 }
 0x44f   :  { %v1306_v37 = vadd.f32 -1.0, %v716_v43 }
 0x451   :  { %v721_v46 = vmul.f32 %v1390_v38, %v1306_v37 }
 0x453   :  { %v722_v47 = vadd.f32 %v721_v46, %v720_v44 }
 0x455   :  { %1391 = vtanh.f32 %v722_v47  ;;  %v1850_v49 = vsel %vm727_vm4, %v722_v47, %v1801_v33 }
 0x45f   :  { %v1392_v45 = vpop.eup %1391 }
 0x460   :  { %v726_v50 = vmul.f32 %v1392_v45, %v724_v39 }
 0x462   :  { %v1853_v51 = vsel %vm727_vm4, %v726_v50, %v1804_v48 }
 0x463   :  { %v730_v52 = vpack.c.bf16 %v1853_v51, %v1853_v51 }
 0x465   :  { %764 = vmatmul.mubr.bf16.vlgmr.msra.gmra.mrb[16].mxu0 %v730_v52  ;;  %805 = vmatmul.mubr.bf16.vlgmr.msra.gmra.mrb[16].mxu1 %v730_v52 }
 0x466   :  { %863 = vmatpush1.bf16.msra.mxu0 %v1468_v3  ;;  %904 = vmatpush1.bf16.msra.mxu1 %v1473_v4 }
 0x467   :  { %864 = vmatprep.subr.bf16.mxu0 %v1479_v5  ;;  %905 = vmatprep.subr.bf16.mxu1 %v1486_v6 }
 0x468   :  { %894 = vmatprep.mubr.bf16.mxu0 %v1430_v1  ;;  %935 = vmatprep.mubr.bf16.mxu1 %v1430_v1 }
 0x46a   :  { %865 = vmatpush1.bf16.msra.mxu0 %v1491_v7  ;;  %906 = vmatpush1.bf16.msra.mxu1 %v1497_v8 }
 0x46b   :  { %866 = vmatprep.subr.bf16.mxu0 %v1503_v9  ;;  %907 = vmatprep.subr.bf16.mxu1 %v1508_v10 }
 0x46e   :  { %867 = vmatpush1.bf16.msra.mxu0 %v1513_v11  ;;  %908 = vmatpush1.bf16.msra.mxu1 %v1518_v12 }
 0x46f   :  { %868 = vmatprep.subr.bf16.mxu0 %v1525_v13  ;;  %909 = vmatprep.subr.bf16.mxu1 %v1532_v14 }
 0x472   :  { %869 = vmatpush1.bf16.msra.mxu0 %v1537_v15  ;;  %910 = vmatpush1.bf16.msra.mxu1 %v1544_v16 }
 0x473   :  { %870 = vmatprep.subr.bf16.mxu0 %v1549_v17  ;;  %911 = vmatprep.subr.bf16.mxu1 %v1556_v18 }
 0x476   :  { %871 = vmatpush1.bf16.msra.mxu0 %v1561_v19  ;;  %912 = vmatpush1.bf16.msra.mxu1 %v1566_v20 }
 0x477   :  { %872 = vmatprep.subr.bf16.mxu0 %v1573_v21  ;;  %913 = vmatprep.subr.bf16.mxu1 %v1580_v22 }
 0x47a   :  { %873 = vmatpush1.bf16.msra.mxu0 %v1587_v23  ;;  %914 = vmatpush1.bf16.msra.mxu1 %v1592_v24 }
 0x47b   :  { %874 = vmatprep.subr.bf16.mxu0 %v1599_v25  ;;  %915 = vmatprep.subr.bf16.mxu1 %v1604_v26 }
 0x47e   :  { %875 = vmatpush1.bf16.msra.mxu0 %v1611_v27  ;;  %916 = vmatpush1.bf16.msra.mxu1 %v1616_v28 }
 0x47f   :  { %876 = vmatprep.subr.bf16.mxu0 %v1623_v29  ;;  %917 = vmatprep.subr.bf16.mxu1 %v1628_v30 }
 0x482   :  { %877 = vmatpush1.bf16.msra.mxu0 %v1635_v31  ;;  %918 = vmatpush1.bf16.msra.mxu1 %v1640_v32 }
 0x483   :  { %993 = vmatprep.subr.bf16.mxu0 %v1455_v0  ;;  %1034 = vmatprep.subr.bf16.mxu1 %v1462_v2 }
 0x538   :  { %v765_v33 = vpop.f32.mrb[16].mxu0  ;;  %v806_v48 = vpop.f32.mrb[16].mxu1 }
 0x539   :  { %v767_v53 = vpop.f32.mrb[17].mxu0  ;;  %v808_v54 = vpop.f32.mrb[17].mxu1 }
 0x53a   :  { %v819_v55 = vcombine.low %v765_v33, %v767_v53  ;;  %v820_v56 = vcombine.low %v806_v48, %v808_v54  ;;  %v769_v57 = vpop.f32.mrb[18].mxu0  ;;  %v810_v58 = vpop.f32.mrb[18].mxu1 }
 0x53b   :  { %v770_v59 = vpop.f32.mrb[19].mxu0  ;;  %v811_v60 = vpop.f32.mrb[19].mxu1 }
 0x53c   :  { %v827_v61 = vrot.slane %v819_v55, %v1684_v40  ;;  %v834_v62 = vrot.slane %v820_v56, %v1684_v40 }
 0x53e   :  { %v835_v35 = vcombine.low %v827_v61, %v834_v62 }
 0x540   :  { %v837_v36 = vadd.f32 %v1307_v63, %v835_v35 }
 0x542   :  { %v1308_v38 = vmul.f32 -1.442695, %v837_v36 }
 0x544   :  { %1393 = vpow2.f32 %v1308_v38 }
 0x54e   :  { %v1394_v41 = vpop.eup %1393 }
 0x54f   :  { %v841_v42 = vadd.f32 1.0, %v1394_v41 }
 0x551   :  { %1395 = vrcp.f32 %v841_v42 }
 0x55b   :  { %v1396_v43 = vpop.eup %1395 }
 0x55c   :  { %v845_v44 = vrot.slane %v1396_v43, 4  ;;  %v849_v37 = vrot.slane %v1396_v43, 2  ;;  %v855_v33 = vrot.slane %v1396_v43, 6 }
 0x55e   :  { %v847_v46 = vmul.f32 2.0, %v845_v44  ;;  %v851_v47 = vmul.f32 %v849_v37, %v1850_v49  ;;  %v1417_v37 = vld [vmem:[%s2031_s1] ss:$16 sps:$4 sm:$0xff]  }
 0x560   :  { %v1309_v39 = vadd.f32 -1.0, %v847_v46  ;;  %v1418_v46 = vld [vmem:[%s2031_s1 + $0x8] ss:$16 sps:$4 sm:$0xff]  }
 0x562   :  { %v852_v45 = vmul.f32 %v1396_v43, %v1309_v39  ;;  %v1420_v39 = vld [vmem:[%s2031_s1 + $0x2c] ss:$16 sps:$4 sm:$0xff]  }
 0x564   :  { %v853_v50 = vadd.f32 %v852_v45, %v851_v47  ;;  %v1419_v47 = vld [vmem:[%s2031_s1 + $0x24] ss:$16 sps:$4 sm:$0xff]   ;;  %v1421_v45 = vld [vmem:[%s2031_s1 + $0x20] ss:$16 sps:$4 sm:$0xff]  }
 0x566   :  { %1397 = vtanh.f32 %v853_v50  ;;  %v1899_v52 = vsel %vm858_vm5, %v853_v50, %v1850_v49  ;;  %v1422_v50 = vld [vmem:[%s2031_s1 + $0x28] ss:$16 sps:$4 sm:$0xff]  }
 0x570   :  { %v1398_v48 = vpop.eup %1397 }
 0x571   :  { %v857_v53 = vmul.f32 %v1398_v48, %v855_v33  ;;  %v1424_v33 = vld [vmem:[%s2031_s1 + $0x4c] ss:$16 sps:$4 sm:$0xff]   ;;  %v1426_v48 = vld [vmem:[%s2031_s1 + $0x48] ss:$16 sps:$4 sm:$0xff]  }
 0x573   :  { %v1902_v54 = vsel %vm858_vm5, %v857_v53, %v1853_v51  ;;  %v1427_v53 = vld [vmem:[%s2031_s1 + $0x64] ss:$16 sps:$4 sm:$0xff]  }
 0x574   :  { %v861_v55 = vpack.c.bf16 %v1902_v54, %v1902_v54 }
 0x576   :  { %895 = vmatmul.mubr.bf16.vlgmr.msra.gmra.mrb[20].mxu0 %v861_v55  ;;  %936 = vmatmul.mubr.bf16.vlgmr.msra.gmra.mrb[20].mxu1 %v861_v55  ;;  %v1429_v55 = vld [vmem:[%s2031_s1 + $0x60] ss:$16 sps:$4 sm:$0xff]  }
 0x577   :  { %994 = vmatpush1.bf16.msra.mxu0 %v1468_v3  ;;  %1035 = vmatpush1.bf16.msra.mxu1 %v1473_v4 }
 0x578   :  { %995 = vmatprep.subr.bf16.mxu0 %v1479_v5  ;;  %1036 = vmatprep.subr.bf16.mxu1 %v1486_v6 }
 0x579   :  { %1025 = vmatprep.mubr.bf16.mxu0 %v1430_v1  ;;  %1066 = vmatprep.mubr.bf16.mxu1 %v1430_v1 }
 0x57b   :  { %996 = vmatpush1.bf16.msra.mxu0 %v1491_v7  ;;  %1037 = vmatpush1.bf16.msra.mxu1 %v1497_v8 }
 0x57c   :  { %997 = vmatprep.subr.bf16.mxu0 %v1503_v9  ;;  %1038 = vmatprep.subr.bf16.mxu1 %v1508_v10 }
 0x57f   :  { %998 = vmatpush1.bf16.msra.mxu0 %v1513_v11  ;;  %1039 = vmatpush1.bf16.msra.mxu1 %v1518_v12 }
 0x580   :  { %999 = vmatprep.subr.bf16.mxu0 %v1525_v13  ;;  %1040 = vmatprep.subr.bf16.mxu1 %v1532_v14 }
 0x583   :  { %1000 = vmatpush1.bf16.msra.mxu0 %v1537_v15  ;;  %1041 = vmatpush1.bf16.msra.mxu1 %v1544_v16 }
 0x584   :  { %1001 = vmatprep.subr.bf16.mxu0 %v1549_v17  ;;  %1042 = vmatprep.subr.bf16.mxu1 %v1556_v18 }
 0x587   :  { %1002 = vmatpush1.bf16.msra.mxu0 %v1561_v19  ;;  %1043 = vmatpush1.bf16.msra.mxu1 %v1566_v20 }
 0x588   :  { %1003 = vmatprep.subr.bf16.mxu0 %v1573_v21  ;;  %1044 = vmatprep.subr.bf16.mxu1 %v1580_v22 }
 0x58b   :  { %1004 = vmatpush1.bf16.msra.mxu0 %v1587_v23  ;;  %1045 = vmatpush1.bf16.msra.mxu1 %v1592_v24 }
 0x58c   :  { %1005 = vmatprep.subr.bf16.mxu0 %v1599_v25  ;;  %1046 = vmatprep.subr.bf16.mxu1 %v1604_v26 }
 0x58f   :  { %1006 = vmatpush1.bf16.msra.mxu0 %v1611_v27  ;;  %1047 = vmatpush1.bf16.msra.mxu1 %v1616_v28 }
 0x590   :  { %1007 = vmatprep.subr.bf16.mxu0 %v1623_v29  ;;  %1048 = vmatprep.subr.bf16.mxu1 %v1628_v30 }
 0x593   :  { %1008 = vmatpush1.bf16.msra.mxu0 %v1635_v31  ;;  %1049 = vmatpush1.bf16.msra.mxu1 %v1640_v32 }
 0x594   :  { %1124 = vmatprep.subr.bf16.mxu0 %v1455_v0  ;;  %1165 = vmatprep.subr.bf16.mxu1 %v1462_v2  ;;  %v1310_v0 = vld [vmem:[%s2032_s0 + $0x28] sm:$0xff] }
 0x649   :  { %v896_v3 = vpop.f32.mrb[20].mxu0  ;;  %v937_v4 = vpop.f32.mrb[20].mxu1 }
 0x64a   :  { %v898_v5 = vpop.f32.mrb[21].mxu0  ;;  %v939_v6 = vpop.f32.mrb[21].mxu1 }
 0x64b   :  { %v950_v7 = vcombine.low %v896_v3, %v898_v5  ;;  %v951_v8 = vcombine.low %v937_v4, %v939_v6  ;;  %v900_v9 = vpop.f32.mrb[22].mxu0  ;;  %v941_v10 = vpop.f32.mrb[22].mxu1 }
 0x64c   :  { %v901_v11 = vpop.f32.mrb[23].mxu0  ;;  %v942_v12 = vpop.f32.mrb[23].mxu1 }
 0x64d   :  { %v958_v13 = vrot.slane %v950_v7, %v1684_v40  ;;  %v965_v14 = vrot.slane %v951_v8, %v1684_v40 }
 0x64f   :  { %v966_v15 = vcombine.low %v958_v13, %v965_v14 }
 0x651   :  { %v968_v2 = vadd.f32 %v1310_v0, %v966_v15 }
 0x653   :  { %v1311_v49 = vmul.f32 -1.442695, %v968_v2 }
 0x655   :  { %1399 = vpow2.f32 %v1311_v49 }
 0x65f   :  { %v1400_v51 = vpop.eup %1399 }
 0x660   :  { %v972_v56 = vadd.f32 1.0, %v1400_v51 }
 0x662   :  { %1401 = vrcp.f32 %v972_v56 }
 0x66c   :  { %v1402_v57 = vpop.eup %1401 }
 0x66d   :  { %v976_v58 = vrot.slane %v1402_v57, 4  ;;  %v980_v59 = vrot.slane %v1402_v57, 2  ;;  %v986_v38 = vrot.slane %v1402_v57, 6 }
 0x66f   :  { %v978_v60 = vmul.f32 2.0, %v976_v58  ;;  %v982_v61 = vmul.f32 %v980_v59, %v1899_v52 }
 0x671   :  { %v1312_v62 = vadd.f32 -1.0, %v978_v60 }
 0x673   :  { %v983_v63 = vmul.f32 %v1402_v57, %v1312_v62 }
 0x675   :  { %v984_v35 = vadd.f32 %v983_v63, %v982_v61 }
 0x677   :  { %1403 = vtanh.f32 %v984_v35  ;;  %v1948_v36 = vsel %vm989_vm6, %v984_v35, %v1899_v52  ;;  %v1423_v52 = vld [vmem:[%s2031_s1 + $0x44] ss:$16 sps:$4 sm:$0xff]  }
 0x681   :  { %v1404_v41 = vpop.eup %1403 }
 0x682   :  { %v988_v42 = vmul.f32 %v1404_v41, %v986_v38  ;;  %v1316_v38 = vld [vmem:[%s2032_s0 + $0x38] sm:$0xff] }
 0x684   :  { %v1951_v43 = vsel %vm989_vm6, %v988_v42, %v1902_v54  ;;  %v1428_v54 = vld [vmem:[%s2031_s1 + $0x6c] ss:$16 sps:$4 sm:$0xff]  }
 0x685   :  { %v992_v44 = vpack.c.bf16 %v1951_v43, %v1951_v43 }
 0x687   :  { %1026 = vmatmul.mubr.bf16.vlgmr.msra.gmra.mrb[24].mxu0 %v992_v44  ;;  %1067 = vmatmul.mubr.bf16.vlgmr.msra.gmra.mrb[24].mxu1 %v992_v44 }
 0x688   :  { %1125 = vmatpush1.bf16.msra.mxu0 %v1417_v37  ;;  %1166 = vmatpush1.bf16.msra.mxu1 %v1418_v46 }
 0x689   :  { %1126 = vmatprep.subr.bf16.mxu0 %v1419_v47  ;;  %1167 = vmatprep.subr.bf16.mxu1 %v1420_v39 }
 0x68a   :  { %1156 = vmatprep.mubr.bf16.mxu0 %v1430_v1  ;;  %1197 = vmatprep.mubr.bf16.mxu1 %v1430_v1  ;;  %v1425_v1 = vld [vmem:[%s2031_s1 + $0x40] ss:$16 sps:$4 sm:$0xff]  }
 0x68c   :  { %1127 = vmatpush1.bf16.msra.mxu0 %v1421_v45  ;;  %1168 = vmatpush1.bf16.msra.mxu1 %v1422_v50 }
 0x68d   :  { %1128 = vmatprep.subr.bf16.mxu0 %v1423_v52  ;;  %1169 = vmatprep.subr.bf16.mxu1 %v1424_v33 }
 0x690   :  { %1129 = vmatpush1.bf16.msra.mxu0 %v1425_v1  ;;  %1170 = vmatpush1.bf16.msra.mxu1 %v1426_v48 }
 0x691   :  { %1130 = vmatprep.subr.bf16.mxu0 %v1427_v53  ;;  %1171 = vmatprep.subr.bf16.mxu1 %v1428_v54 }
 0x694   :  { %1131 = vmatpush1.bf16.msra.mxu0 %v1429_v55  ;;  %1172 = vmatpush1.bf16.msra.mxu1 %v1544_v16 }
 0x695   :  { %1132 = vmatprep.subr.bf16.mxu0 %v1549_v17  ;;  %1173 = vmatprep.subr.bf16.mxu1 %v1556_v18 }
 0x698   :  { %1133 = vmatpush1.bf16.msra.mxu0 %v1561_v19  ;;  %1174 = vmatpush1.bf16.msra.mxu1 %v1566_v20 }
 0x699   :  { %1134 = vmatprep.subr.bf16.mxu0 %v1573_v21  ;;  %1175 = vmatprep.subr.bf16.mxu1 %v1580_v22 }
 0x69c   :  { %1135 = vmatpush1.bf16.msra.mxu0 %v1587_v23  ;;  %1176 = vmatpush1.bf16.msra.mxu1 %v1592_v24 }
 0x69d   :  { %1136 = vmatprep.subr.bf16.mxu0 %v1599_v25  ;;  %1177 = vmatprep.subr.bf16.mxu1 %v1604_v26 }
 0x6a0   :  { %1137 = vmatpush1.bf16.msra.mxu0 %v1611_v27  ;;  %1178 = vmatpush1.bf16.msra.mxu1 %v1616_v28  ;;  %v1313_v28 = vld [vmem:[%s2032_s0 + $0x30] sm:$0xff] }
 0x6a1   :  { %1138 = vmatprep.subr.bf16.mxu0 %v1623_v29  ;;  %1179 = vmatprep.subr.bf16.mxu1 %v1628_v30 }
 0x6a4   :  { %1139 = vmatpush1.bf16.msra.mxu0 %v1635_v31  ;;  %1180 = vmatpush1.bf16.msra.mxu1 %v1640_v32 }
 0x75a   :  { %v1027_v16 = vpop.f32.mrb[24].mxu0  ;;  %v1068_v17 = vpop.f32.mrb[24].mxu1 }
 0x75b   :  { %v1029_v18 = vpop.f32.mrb[25].mxu0  ;;  %v1070_v19 = vpop.f32.mrb[25].mxu1 }
 0x75c   :  { %v1081_v20 = vcombine.low %v1027_v16, %v1029_v18  ;;  %v1082_v21 = vcombine.low %v1068_v17, %v1070_v19  ;;  %v1031_v22 = vpop.f32.mrb[26].mxu0  ;;  %v1072_v23 = vpop.f32.mrb[26].mxu1 }
 0x75d   :  { %v1032_v24 = vpop.f32.mrb[27].mxu0  ;;  %v1073_v25 = vpop.f32.mrb[27].mxu1 }
 0x75e   :  { %v1089_v26 = vrot.slane %v1081_v20, %v1684_v40  ;;  %v1096_v27 = vrot.slane %v1082_v21, %v1684_v40 }
 0x760   :  { %v1097_v29 = vcombine.low %v1089_v26, %v1096_v27 }
 0x762   :  { %v1099_v30 = vadd.f32 %v1313_v28, %v1097_v29 }
 0x764   :  { %v1314_v31 = vmul.f32 -1.442695, %v1099_v30 }
 0x766   :  { %1405 = vpow2.f32 %v1314_v31 }
 0x770   :  { %v1406_v32 = vpop.eup %1405 }
 0x771   :  { %v1103_v3 = vadd.f32 1.0, %v1406_v32 }
 0x773   :  { %1407 = vrcp.f32 %v1103_v3 }
 0x77d   :  { %v1408_v4 = vpop.eup %1407 }
 0x77e   :  { %v1107_v5 = vrot.slane %v1408_v4, 4  ;;  %v1111_v6 = vrot.slane %v1408_v4, 2  ;;  %v1117_v13 = vrot.slane %v1408_v4, 6 }
 0x780   :  { %v1109_v7 = vmul.f32 2.0, %v1107_v5  ;;  %v1113_v8 = vmul.f32 %v1111_v6, %v1948_v36 }
 0x782   :  { %v1315_v9 = vadd.f32 -1.0, %v1109_v7 }
 0x784   :  { %v1114_v10 = vmul.f32 %v1408_v4, %v1315_v9 }
 0x786   :  { %v1115_v11 = vadd.f32 %v1114_v10, %v1113_v8 }
 0x788   :  { %1409 = vtanh.f32 %v1115_v11  ;;  %v1122_v12 = vsel %vm1120_vm7, %v1115_v11, %v1948_v36 }
 0x792   :  { %v1410_v14 = vpop.eup %1409 }
 0x793   :  { %v1119_v0 = vmul.f32 %v1410_v14, %v1117_v13 }
 0x795   :  { %v1121_v15 = vsel %vm1120_vm7, %v1119_v0, %v1951_v43 }
 0x796   :  { %v1123_v2 = vpack.c.bf16 %v1121_v15, %v1121_v15 }
 0x798   :  { %1157 = vmatmul.mubr.bf16.vlgmr.msra.gmra.mrb[28].mxu0 %v1123_v2  ;;  %1198 = vmatmul.mubr.bf16.vlgmr.msra.gmra.mrb[28].mxu1 %v1123_v2 }
 0x86b   :  { %v1158_v49 = vpop.f32.mrb[28].mxu0  ;;  %v1199_v51 = vpop.f32.mrb[28].mxu1 }
 0x86c   :  { %v1160_v56 = vpop.f32.mrb[29].mxu0  ;;  %v1201_v57 = vpop.f32.mrb[29].mxu1 }
 0x86d   :  { %v1212_v58 = vcombine.low %v1158_v49, %v1160_v56  ;;  %v1213_v59 = vcombine.low %v1199_v51, %v1201_v57  ;;  %v1162_v60 = vpop.f32.mrb[30].mxu0  ;;  %v1203_v61 = vpop.f32.mrb[30].mxu1 }
 0x86e   :  { %v1163_v62 = vpop.f32.mrb[31].mxu0  ;;  %v1204_v63 = vpop.f32.mrb[31].mxu1 }
 0x86f   :  { %v1220_v35 = vrot.slane %v1212_v58, %v1684_v40  ;;  %v1227_v36 = vrot.slane %v1213_v59, %v1684_v40 }
 0x871   :  { %v1228_v41 = vcombine.low %v1220_v35, %v1227_v36 }
 0x873   :  { %v1230_v42 = vadd.f32 %v1316_v38, %v1228_v41 }
 0x875   :  { %v1317_v43 = vmul.f32 -1.442695, %v1230_v42 }
 0x877   :  { %1411 = vpow2.f32 %v1317_v43 }
 0x881   :  { %v1412_v44 = vpop.eup %1411 }
 0x882   :  { %v1234_v37 = vadd.f32 1.0, %v1412_v44 }
 0x884   :  { %1413 = vrcp.f32 %v1234_v37 }
 0x88e   :  { %v1414_v46 = vpop.eup %1413 }
 0x88f   :  { %v1238_v47 = vrot.slane %v1414_v46, 4  ;;  %v1242_v39 = vrot.slane %v1414_v46, 2  ;;  %v1248_v40 = vrot.slane %v1414_v46, 6 }
 0x891   :  { %v1240_v45 = vmul.f32 2.0, %v1238_v47  ;;  %v1244_v50 = vmul.f32 %v1242_v39, %v1122_v12 }
 0x893   :  { %v1318_v52 = vadd.f32 -1.0, %v1240_v45 }
 0x895   :  { %v1245_v33 = vmul.f32 %v1414_v46, %v1318_v52 }
 0x897   :  { %v1246_v1 = vadd.f32 %v1245_v33, %v1244_v50 }
 0x899   :  { %1415 = vtanh.f32 %v1246_v1 }
 0x8a3   :  { %v1416_v48 = vpop.eup %1415 }
 0x8a4   :  { %v1250_v53 = vmul.f32 %v1416_v48, %v1248_v40 }
 0x8a6   :  { %v1252_v54 = vsel %vm1251_vm8, %v1250_v53, %v1121_v15 }
 0x8a7   :  { %1253 = vst [vmem:[%s2034_s3] sm:$0x3] %v1252_v54 }

</bundles_post_ra>
